<compile_context>
chip_gen: v5e
topology: v5e:2x2
jax: 0.10.0
libtpu: 0.0.40
codegen_flags: <defaults>
</compile_context>

<pallas_src>
import jax
import jax.numpy as jnp
from jax import lax
from jax.experimental import pallas as pl
from jax.experimental.pallas import tpu as pltpu


# ---------------------------------------------------------------------------
# Tile selection helper
# ---------------------------------------------------------------------------
def _pick_tile(n, pref, align):
    """Largest tile <= pref that divides n and is a multiple of `align`
    (returns n itself when n <= pref, i.e. the block equals the full dim)."""
    if n <= pref:
        return n
    t = (pref // align) * align
    while t >= align and n % t != 0:
        t -= align
    return t if (t >= align and n % t == 0) else n


# ---------------------------------------------------------------------------
# Kernel 1: fused node-wise transform  HL = x@Wfl + bfl,  HR = x@Wfr + bfr
# (linear_pre already folded into Wfl/Wfr/bfl/bfr in the wrapper)
# ---------------------------------------------------------------------------
def _pre_kernel(x_ref, wl_ref, bl_ref, wr_ref, br_ref, hl_ref, hr_ref):
    x = x_ref[...]
    hl = jnp.dot(x, wl_ref[...], preferred_element_type=jnp.float32) + bl_ref[...]
    hr = jnp.dot(x, wr_ref[...], preferred_element_type=jnp.float32) + br_ref[...]
    hl_ref[...] = hl.astype(hl_ref.dtype)
    hr_ref[...] = hr.astype(hr_ref.dtype)


def _pre_transform(x_bf, wfl, bfl, wfr, bfr, *, tm):
    n, in_dim = x_bf.shape
    hid = wfl.shape[1]
    return pl.pallas_call(
        _pre_kernel,
        out_shape=(jax.ShapeDtypeStruct((n, hid), jnp.bfloat16),
                   jax.ShapeDtypeStruct((n, hid), jnp.bfloat16)),
        grid_spec=pltpu.PrefetchScalarGridSpec(
            num_scalar_prefetch=0,
            grid=(n // tm,),
            in_specs=[
                pl.BlockSpec((tm, in_dim), lambda i: (i, 0)),
                pl.BlockSpec((in_dim, hid), lambda i: (0, 0)),
                pl.BlockSpec((1, hid), lambda i: (0, 0)),
                pl.BlockSpec((in_dim, hid), lambda i: (0, 0)),
                pl.BlockSpec((1, hid), lambda i: (0, 0)),
            ],
            out_specs=(
                pl.BlockSpec((tm, hid), lambda i: (i, 0)),
                pl.BlockSpec((tm, hid), lambda i: (i, 0)),
            )),
        compiler_params=pltpu.CompilerParams(dimension_semantics=("parallel",)),
    )(x_bf, wfl, bfl, wfr, bfr)


# ---------------------------------------------------------------------------
# Kernel 2: layer-1 aggregation + combine + ReLU
#   H1[i] = relu( sum_k A[i,k] @ HL[k] + bl1 + HR[i] )
# ---------------------------------------------------------------------------
def _sage_layer1_kernel(a_ref, hl_ref, hr_ref, b_ref, h1_ref, acc_ref):
    k = pl.program_id(1)

    @pl.when(k == 0)
    def _():
        acc_ref[...] = jnp.zeros_like(acc_ref)

    acc_ref[...] += jnp.dot(a_ref[...], hl_ref[...],
                            preferred_element_type=jnp.float32)

    @pl.when(k == pl.num_programs(1) - 1)
    def _():
        h = acc_ref[...] + b_ref[...] + hr_ref[...].astype(jnp.float32)
        h1_ref[...] = jnp.maximum(h, 0.0).astype(h1_ref.dtype)


def _sage_layer1(a_bf, hl, hr, bl1, *, tm, tk):
    n = a_bf.shape[0]
    hid = hl.shape[1]
    return pl.pallas_call(
        _sage_layer1_kernel,
        out_shape=jax.ShapeDtypeStruct((n, hid), jnp.bfloat16),
        grid_spec=pltpu.PrefetchScalarGridSpec(
            num_scalar_prefetch=0,
            grid=(n // tm, n // tk),
            in_specs=[
                pl.BlockSpec((tm, tk), lambda i, k: (i, k)),
                pl.BlockSpec((tk, hid), lambda i, k: (k, 0)),
                pl.BlockSpec((tm, hid), lambda i, k: (i, 0)),
                pl.BlockSpec((1, hid), lambda i, k: (0, 0)),
            ],
            out_specs=pl.BlockSpec((tm, hid), lambda i, k: (i, 0)),
            scratch_shapes=[pltpu.VMEM((tm, hid), jnp.float32)]),
        compiler_params=pltpu.CompilerParams(
            dimension_semantics=("parallel", "arbitrary")),
    )(a_bf, hl, hr, bl1)


# ---------------------------------------------------------------------------
# Kernel 3: layer-2 aggregation + combine + L2 row-normalize (lane-dense output)
#   out[i] = normalize( (sum_k A[i,k] @ H1[k]) @ Wl2p + bl2p + H1[i] @ Wr2p )
# ---------------------------------------------------------------------------
def _sage_layer2_kernel(a_ref, h1k_ref, h1i_ref, wl_ref, b_ref, wr_ref,
                        out_ref, acc_ref):
    k = pl.program_id(1)

    @pl.when(k == 0)
    def _():
        acc_ref[...] = jnp.zeros_like(acc_ref)

    acc_ref[...] += jnp.dot(a_ref[...], h1k_ref[...],
                            preferred_element_type=jnp.float32)

    @pl.when(k == pl.num_programs(1) - 1)
    def _():
        agg = acc_ref[...].astype(jnp.bfloat16)
        o = jnp.dot(agg, wl_ref[...], preferred_element_type=jnp.float32)
        o = o + b_ref[...]
        o = o + jnp.dot(h1i_ref[...], wr_ref[...],
                        preferred_element_type=jnp.float32)
        # F.normalize(p=2, dim=-1): padded columns are exactly zero, so the
        # squared-sum over the padded row equals the true row norm^2.
        ss = jnp.sum(o * o, axis=-1, keepdims=True)
        out_ref[...] = o * lax.rsqrt(jnp.maximum(ss, 1e-24))


def _sage_layer2(a_bf, h1, wl2p, bl2p, wr2p, *, tm, tk):
    n = a_bf.shape[0]
    hid = h1.shape[1]
    out_pad = wl2p.shape[1]
    return pl.pallas_call(
        _sage_layer2_kernel,
        out_shape=jax.ShapeDtypeStruct((n, out_pad), jnp.float32),
        grid_spec=pltpu.PrefetchScalarGridSpec(
            num_scalar_prefetch=0,
            grid=(n // tm, n // tk),
            in_specs=[
                pl.BlockSpec((tm, tk), lambda i, k: (i, k)),
                pl.BlockSpec((tk, hid), lambda i, k: (k, 0)),
                pl.BlockSpec((tm, hid), lambda i, k: (i, 0)),
                pl.BlockSpec((hid, out_pad), lambda i, k: (0, 0)),
                pl.BlockSpec((1, out_pad), lambda i, k: (0, 0)),
                pl.BlockSpec((hid, out_pad), lambda i, k: (0, 0)),
            ],
            out_specs=pl.BlockSpec((tm, out_pad), lambda i, k: (i, 0)),
            scratch_shapes=[pltpu.VMEM((tm, hid), jnp.float32)]),
        compiler_params=pltpu.CompilerParams(
            dimension_semantics=("parallel", "arbitrary")),
    )(a_bf, h1, h1, wl2p, bl2p, wr2p)


# ---------------------------------------------------------------------------
# Full forward
# ---------------------------------------------------------------------------
def sage_forward(a_mean, x, wpre, bpre, wl1, bl1, wr1, wl2, bl2, wr2,
                 *, tm=256, tk=512):
    n, _ = x.shape
    out_dim = wl2.shape[1]
    out_pad = max(128, -(-out_dim // 128) * 128)

    # Fold linear_pre into conv_first's lin_l / lin_r (exact; no nonlinearity between).
    wfl = wpre @ wl1
    bfl = bpre @ wl1
    wfr = wpre @ wr1
    bfr = bpre @ wr1

    # Zero-pad the final feature dim to a lane-dense (multiple of 128) width.
    pad = out_pad - out_dim
    wl2p = jnp.pad(wl2, ((0, 0), (0, pad)))
    wr2p = jnp.pad(wr2, ((0, 0), (0, pad)))
    bl2p = jnp.pad(bl2, ((0, 0), (0, pad)))

    # bf16 MXU operands; f32 accumulation / VPU math inside the kernels.
    bf = jnp.bfloat16
    a_bf = a_mean.astype(bf)
    x_bf = x.astype(bf)

    tm = _pick_tile(n, tm, 8)
    tk = _pick_tile(n, tk, 128)

    hl, hr = _pre_transform(x_bf, wfl.astype(bf), bfl, wfr.astype(bf), bfr, tm=tm)
    h1 = _sage_layer1(a_bf, hl, hr, bl1, tm=tm, tk=tk)
    out_p = _sage_layer2(a_bf, h1, wl2p.astype(bf), bl2p, wr2p.astype(bf),
                         tm=tm, tk=tk)
    return out_p[:, :out_dim]


# ---------------------------------------------------------------------------
# Plain-JAX glue: mean-aggregation matrix (SAGEConv 'mean', source->target)
# ---------------------------------------------------------------------------
def build_mean_adjacency(edge_index, num_nodes):
    src, dst = edge_index[0], edge_index[1]
    adj = jnp.zeros((num_nodes, num_nodes), jnp.float32).at[dst, src].add(1.0)
    deg = jnp.sum(adj, axis=1, keepdims=True)
    return adj * jnp.where(deg > 0, 1.0 / deg, 0.0)


def sage_reference(a_mean, x, wpre, bpre, wl1, bl1, wr1, wl2, bl2, wr2):
    """Pure-JAX f32 reference for validation."""
    h = x @ wpre + bpre
    h1 = jnp.maximum((a_mean @ h) @ wl1 + bl1 + h @ wr1, 0.0)
    o = (a_mean @ h1) @ wl2 + bl2 + h1 @ wr2
    nrm = jnp.sqrt(jnp.sum(o * o, axis=-1, keepdims=True))
    return o / jnp.maximum(nrm, 1e-12)


if __name__ == "__main__":
    # Small shapes consistent with the module's __init__
    N = 64            # number of graph nodes
    E = 256           # number of edges
    input_dim = 16
    feature_dim = 32
    hidden_dim = 32
    output_dim = 16

    key = jax.random.PRNGKey(0)
    (k_x, k_e, k_wp, k_bp, k_wl1, k_wr1, k_wl2, k_wr2) = jax.random.split(key, 8)

    # data.x and data.edge_index
    x = jax.random.normal(k_x, (N, input_dim), jnp.float32)
    edge_index = jax.random.randint(k_e, (2, E), 0, N, jnp.int32)

    def uniform_init(k, shape, fan_in):
        bound = 1.0 / jnp.sqrt(jnp.float32(fan_in))
        return jax.random.uniform(k, shape, jnp.float32, -bound, bound)

    # linear_pre
    wpre = uniform_init(k_wp, (input_dim, feature_dim), input_dim)
    bpre = uniform_init(k_bp, (1, feature_dim), input_dim)
    # conv_first (SAGEConv): lin_l (aggregated, with bias), lin_r (root, no bias)
    wl1 = uniform_init(k_wl1, (feature_dim, hidden_dim), feature_dim)
    bl1 = jnp.zeros((1, hidden_dim), jnp.float32)
    wr1 = uniform_init(k_wr1, (feature_dim, hidden_dim), feature_dim)
    # conv_out (SAGEConv)
    wl2 = uniform_init(k_wl2, (hidden_dim, output_dim), hidden_dim)
    bl2 = jnp.zeros((1, output_dim), jnp.float32)
    wr2 = uniform_init(k_wr2, (hidden_dim, output_dim), hidden_dim)

    a_mean = build_mean_adjacency(edge_index, N)

    out = sage_forward(a_mean, x, wpre, bpre, wl1, bl1, wr1, wl2, bl2, wr2)
    out = jax.block_until_ready(out)

    assert out.shape == (N, output_dim)
    assert bool(jnp.all(jnp.isfinite(out)))

    # rows should be unit-norm after F.normalize (done in f32 inside the kernel)
    row_norms = jnp.linalg.norm(out, axis=-1)
    assert bool(jnp.all(jnp.abs(row_norms - 1.0) < 1e-4))

    # bf16 MXU operands vs f32 reference: loose tolerance
    ref = sage_reference(a_mean, x, wpre, bpre, wl1, bl1, wr1, wl2, bl2, wr2)
    max_err = float(jnp.max(jnp.abs(out - ref)))
    assert max_err < 5e-2, f"max abs err vs f32 reference too large: {max_err}"

    print("KERNEL_OK")
</pallas_src>

<mosaic_0001>
module attributes {stable_mosaic.version = 11 : i64} {
  func.func @_pre_kernel(%arg0: i32, %arg1: memref<64x16xbf16, #tpu.memory_space<vmem>>, %arg2: memref<16x32xbf16, #tpu.memory_space<vmem>>, %arg3: memref<1x32xf32, #tpu.memory_space<vmem>>, %arg4: memref<16x32xbf16, #tpu.memory_space<vmem>>, %arg5: memref<1x32xf32, #tpu.memory_space<vmem>>, %arg6: memref<64x32xbf16, #tpu.memory_space<vmem>>, %arg7: memref<64x32xbf16, #tpu.memory_space<vmem>>) attributes {dimension_semantics = [#tpu.dimension_semantics<parallel>], iteration_bounds = array<i64: 1>, scalar_prefetch = 0 : i64, scratch_operands = 0 : i64, tpu.core_type = #tpu.core_type<tc>, window_params = [{transform_indices = @transform_0, window_bounds = array<i64: 64, 16>}, {pipeline_mode = #tpu.pipeline_mode<synchronous>, transform_indices = @transform_1, window_bounds = array<i64: 16, 32>}, {pipeline_mode = #tpu.pipeline_mode<synchronous>, transform_indices = @transform_2, window_bounds = array<i64: 1, 32>}, {pipeline_mode = #tpu.pipeline_mode<synchronous>, transform_indices = @transform_3, window_bounds = array<i64: 16, 32>}, {pipeline_mode = #tpu.pipeline_mode<synchronous>, transform_indices = @transform_4, window_bounds = array<i64: 1, 32>}, {transform_indices = @transform_5, window_bounds = array<i64: 64, 32>}, {transform_indices = @transform_6, window_bounds = array<i64: 64, 32>}]} {
    %c0 = arith.constant 0 : index
    %c0_0 = arith.constant 0 : index
    %0 = vector.load %arg1[%c0, %c0_0] : memref<64x16xbf16, #tpu.memory_space<vmem>>, vector<64x16xbf16>
    %c0_1 = arith.constant 0 : index
    %c0_2 = arith.constant 0 : index
    %1 = vector.load %arg2[%c0_1, %c0_2] : memref<16x32xbf16, #tpu.memory_space<vmem>>, vector<16x32xbf16>
    %cst = arith.constant dense<0.000000e+00> : vector<64x32xf32>
    %2 = tpu.matmul %0, %1, %cst {dimension_numbers = #tpu.dot_dimension_numbers<[1], [0], [0], [1], [0, 0, 1, 1], [], []>} : vector<64x16xbf16>, vector<16x32xbf16>, vector<64x32xf32> -> vector<64x32xf32>
    %c0_3 = arith.constant 0 : index
    %c0_4 = arith.constant 0 : index
    %3 = vector.load %arg3[%c0_3, %c0_4] : memref<1x32xf32, #tpu.memory_space<vmem>>, vector<1x32xf32>
    %4 = vector.broadcast %3 : vector<1x32xf32> to vector<64x32xf32>
    %5 = arith.addf %2, %4 : vector<64x32xf32>
    %c0_5 = arith.constant 0 : index
    %c0_6 = arith.constant 0 : index
    %6 = vector.load %arg4[%c0_5, %c0_6] : memref<16x32xbf16, #tpu.memory_space<vmem>>, vector<16x32xbf16>
    %cst_7 = arith.constant dense<0.000000e+00> : vector<64x32xf32>
    %7 = tpu.matmul %0, %6, %cst_7 {dimension_numbers = #tpu.dot_dimension_numbers<[1], [0], [0], [1], [0, 0, 1, 1], [], []>} : vector<64x16xbf16>, vector<16x32xbf16>, vector<64x32xf32> -> vector<64x32xf32>
    %c0_8 = arith.constant 0 : index
    %c0_9 = arith.constant 0 : index
    %8 = vector.load %arg5[%c0_8, %c0_9] : memref<1x32xf32, #tpu.memory_space<vmem>>, vector<1x32xf32>
    %9 = vector.broadcast %8 : vector<1x32xf32> to vector<64x32xf32>
    %10 = arith.addf %7, %9 : vector<64x32xf32>
    %11 = arith.truncf %5 : vector<64x32xf32> to vector<64x32xbf16>
    %c0_10 = arith.constant 0 : index
    %c0_11 = arith.constant 0 : index
    %12 = vector.load %arg6[%c0_10, %c0_11] : memref<64x32xbf16, #tpu.memory_space<vmem>>, vector<64x32xbf16>
    tpu.vector_store %arg6[%c0_10, %c0_11], %11 {strides = array<i32>} : memref<64x32xbf16, #tpu.memory_space<vmem>>, vector<64x32xbf16>,
    %13 = arith.truncf %10 : vector<64x32xf32> to vector<64x32xbf16>
    %c0_12 = arith.constant 0 : index
    %c0_13 = arith.constant 0 : index
    %14 = vector.load %arg7[%c0_12, %c0_13] : memref<64x32xbf16, #tpu.memory_space<vmem>>, vector<64x32xbf16>
    tpu.vector_store %arg7[%c0_12, %c0_13], %13 {strides = array<i32>} : memref<64x32xbf16, #tpu.memory_space<vmem>>, vector<64x32xbf16>,
    return
  }
  func.func @transform_0(%arg0: i32) -> (i32, i32) {
    %c0_i32 = arith.constant 0 : i32
    %c0_i32_0 = arith.constant 0 : i32
    return %arg0, %c0_i32 : i32, i32
  }
  func.func @transform_1(%arg0: i32) -> (i32, i32) {
    %c0_i32 = arith.constant 0 : i32
    %c0_i32_0 = arith.constant 0 : i32
    %c0_i32_1 = arith.constant 0 : i32
    return %c0_i32, %c0_i32_0 : i32, i32
  }
  func.func @transform_2(%arg0: i32) -> (i32, i32) {
    %c0_i32 = arith.constant 0 : i32
    %c0_i32_0 = arith.constant 0 : i32
    %c0_i32_1 = arith.constant 0 : i32
    return %c0_i32, %c0_i32_0 : i32, i32
  }
  func.func @transform_3(%arg0: i32) -> (i32, i32) {
    %c0_i32 = arith.constant 0 : i32
    %c0_i32_0 = arith.constant 0 : i32
    %c0_i32_1 = arith.constant 0 : i32
    return %c0_i32, %c0_i32_0 : i32, i32
  }
  func.func @transform_4(%arg0: i32) -> (i32, i32) {
    %c0_i32 = arith.constant 0 : i32
    %c0_i32_0 = arith.constant 0 : i32
    %c0_i32_1 = arith.constant 0 : i32
    return %c0_i32, %c0_i32_0 : i32, i32
  }
  func.func @transform_5(%arg0: i32) -> (i32, i32) {
    %c0_i32 = arith.constant 0 : i32
    %c0_i32_0 = arith.constant 0 : i32
    return %arg0, %c0_i32 : i32, i32
  }
  func.func @transform_6(%arg0: i32) -> (i32, i32) {
    %c0_i32 = arith.constant 0 : i32
    %c0_i32_0 = arith.constant 0 : i32
    return %arg0, %c0_i32 : i32, i32
  }
}

</mosaic_0001>

<bundles_post_ra>
// kernel: tpu_custom_call.1
= control target key start
LH: loop header
LB: loop body
LE: loop exit
PB: predicated region body
PF: predicated region fallthrough
CT: control target
= control target key end

     0   :  { %vm63_vm0 = vcmask 130048   ;;  %vm154_vm1 = vcmask 257024   ;;  %s362_s1 = inlined_call_operand.vmem [shape: bf16[16,32], index: 1, kind: input, shape index: {}]   ;;  %s363_s3 = inlined_call_operand.vmem [shape: bf16[16,32], index: 3, kind: input, shape index: {}]   ;;  %s364_s0 = inlined_call_operand.vmem [shape: bf16[64,16], index: 0, kind: input, shape index: {}]   ;;  %s365_s2 = inlined_call_operand.vmem [shape: f32[1,32], index: 2, kind: input, shape index: {}]   ;;  %s366_s4 = inlined_call_operand.vmem [shape: f32[1,32], index: 4, kind: input, shape index: {}]   ;;  %s367_s5 = inlined_call_operand.vmem [shape: bf16[64,32], index: 5, kind: output, shape index: {0}]   ;;  %s368_s6 = inlined_call_operand.vmem [shape: bf16[64,32], index: 6, kind: output, shape index: {1}]  }
   0x1   :  { %v223_v0 = vld [vmem:[%s362_s1] sm:$0xff]  ;;  %v221_v3 = vld [vmem:[%s364_s0 + $0x10] sm:$0xff]  ;;  %v220_v4 = vld [vmem:[%s364_s0 + $0x8] sm:$0xff] }
   0x2   :  { %v224_v1 = vld [vmem:[%s363_s3] sm:$0xff]  ;;  %83 = vmatpush.bf16.msra.mxu0 %v223_v0  ;;  %225 = vmatpush.bf16.msra.mxu2 %v223_v0  ;;  %v222_v5 = vld [vmem:[%s364_s0 + $0x18] sm:$0xff] }
   0x3   :  { %v219_v2 = vld [vmem:[%s364_s0] sm:$0xff]  ;;  %124 = vmatpush.bf16.msra.mxu1 %v224_v1  ;;  %226 = vmatpush.bf16.msra.mxu3 %v224_v1 }
   0x4   :  { %v227_v6 = vld [vmem:[%s365_s2] ss:$0 sm:$0xff] }
   0x5   :  { %207 = vmatmul.msk.bf16.vlgmr.msra.gmra.mxu0 %vm63_vm0, %v219_v2  ;;  %209 = vmatmul.msk.bf16.vlgmr.msra.gmra.mxu2 %vm63_vm0, %v221_v3  ;;  %v288_v7 = vld [vmem:[%s366_s4] ss:$0 sm:$0xff] }
   0x6   :  { %215 = vmatmul.msk.bf16.vlgmr.msra.gmra.mxu1 %vm63_vm0, %v219_v2  ;;  %217 = vmatmul.msk.bf16.vlgmr.msra.gmra.mxu3 %vm63_vm0, %v221_v3 }
  0x15   :  { %208 = vmatmul.msk.bf16.gmra.mxu0 %vm63_vm0, %v220_v4  ;;  %210 = vmatmul.msk.bf16.gmra.mxu2 %vm63_vm0, %v222_v5 }
  0x16   :  { %216 = vmatmul.msk.bf16.gmra.mxu1 %vm63_vm0, %v220_v4  ;;  %218 = vmatmul.msk.bf16.gmra.mxu3 %vm63_vm0, %v222_v5 }
  0x82   :  { %v85_v8 = vpop.f32.mrf.mxu0 }
  0x83   :  { %v86_v9 = vadd.f32 %v227_v6, %v85_v8  ;;  %v126_v10 = vpop.f32.mrf.mxu1 }
  0x84   :  { %v127_v11 = vadd.f32 %v288_v7, %v126_v10 }
  0x85   :  { %v146_v12 = vpack.c.bf16 %v86_v9, %v86_v9 }
  0x86   :  { %v163_v13 = vpack.c.bf16 %v127_v11, %v127_v11 }
  0x87   :  { %155 = vst.msk [vmem:[%s367_s5] sm:$0xf] %vm154_vm1, %v146_v12 }
  0x88   :  { %171 = vst.msk [vmem:[%s368_s6] sm:$0xf] %vm154_vm1, %v163_v13  ;;  %v95_v14 = vpop.f32.mrf.mxu2 }
  0x89   :  { %v96_v15 = vadd.f32 %v227_v6, %v95_v14  ;;  %v136_v16 = vpop.f32.mrf.mxu3 }
  0x8a   :  { %v137_v17 = vadd.f32 %v288_v7, %v136_v16  ;;  %v87_v18 = vpop.f32.mrf.mxu0 }
  0x8b   :  { %v150_v19 = vpack.c.bf16 %v96_v15, %v96_v15  ;;  %v88_v20 = vadd.f32 %v227_v6, %v87_v18  ;;  %v128_v21 = vpop.f32.mrf.mxu1 }
  0x8c   :  { %v167_v22 = vpack.c.bf16 %v137_v17, %v137_v17  ;;  %v129_v23 = vadd.f32 %v288_v7, %v128_v21 }
  0x8d   :  { %159 = vst.msk [vmem:[%s367_s5 + $0x10] sm:$0xf] %vm154_vm1, %v150_v19  ;;  %v147_v24 = vpack.c.bf16 %v88_v20, %v88_v20 }
  0x8e   :  { %175 = vst.msk [vmem:[%s368_s6 + $0x10] sm:$0xf] %vm154_vm1, %v167_v22  ;;  %v164_v25 = vpack.c.bf16 %v129_v23, %v129_v23 }
  0x8f   :  { %156 = vst.msk [vmem:[%s367_s5 + $0x4] sm:$0xf] %vm154_vm1, %v147_v24 }
  0x90   :  { %172 = vst.msk [vmem:[%s368_s6 + $0x4] sm:$0xf] %vm154_vm1, %v164_v25  ;;  %v97_v26 = vpop.f32.mrf.mxu2 }
  0x91   :  { %v98_v27 = vadd.f32 %v227_v6, %v97_v26  ;;  %v138_v28 = vpop.f32.mrf.mxu3 }
  0x92   :  { %v139_v29 = vadd.f32 %v288_v7, %v138_v28  ;;  %v90_v30 = vpop.f32.mrf.mxu0 }
  0x93   :  { %v151_v31 = vpack.c.bf16 %v98_v27, %v98_v27  ;;  %v91_v32 = vadd.f32 %v227_v6, %v90_v30  ;;  %v131_v33 = vpop.f32.mrf.mxu1 }
  0x94   :  { %v168_v34 = vpack.c.bf16 %v139_v29, %v139_v29  ;;  %v132_v35 = vadd.f32 %v288_v7, %v131_v33 }
  0x95   :  { %160 = vst.msk [vmem:[%s367_s5 + $0x14] sm:$0xf] %vm154_vm1, %v151_v31  ;;  %v148_v36 = vpack.c.bf16 %v91_v32, %v91_v32 }
  0x96   :  { %176 = vst.msk [vmem:[%s368_s6 + $0x14] sm:$0xf] %vm154_vm1, %v168_v34  ;;  %v165_v37 = vpack.c.bf16 %v132_v35, %v132_v35 }
  0x97   :  { %157 = vst.msk [vmem:[%s367_s5 + $0x8] sm:$0xf] %vm154_vm1, %v148_v36 }
  0x98   :  { %173 = vst.msk [vmem:[%s368_s6 + $0x8] sm:$0xf] %vm154_vm1, %v165_v37  ;;  %v100_v38 = vpop.f32.mrf.mxu2 }
  0x99   :  { %v101_v39 = vadd.f32 %v227_v6, %v100_v38  ;;  %v141_v40 = vpop.f32.mrf.mxu3 }
  0x9a   :  { %v142_v41 = vadd.f32 %v288_v7, %v141_v40  ;;  %v92_v42 = vpop.f32.mrf.mxu0 }
  0x9b   :  { %v152_v43 = vpack.c.bf16 %v101_v39, %v101_v39  ;;  %v93_v44 = vadd.f32 %v227_v6, %v92_v42  ;;  %v133_v45 = vpop.f32.mrf.mxu1 }
  0x9c   :  { %v169_v46 = vpack.c.bf16 %v142_v41, %v142_v41  ;;  %v134_v47 = vadd.f32 %v288_v7, %v133_v45 }
  0x9d   :  { %161 = vst.msk [vmem:[%s367_s5 + $0x18] sm:$0xf] %vm154_vm1, %v152_v43  ;;  %v149_v48 = vpack.c.bf16 %v93_v44, %v93_v44 }
  0x9e   :  { %177 = vst.msk [vmem:[%s368_s6 + $0x18] sm:$0xf] %vm154_vm1, %v169_v46  ;;  %v166_v49 = vpack.c.bf16 %v134_v47, %v134_v47 }
  0x9f   :  { %158 = vst.msk [vmem:[%s367_s5 + $0xc] sm:$0xf] %vm154_vm1, %v149_v48 }
  0xa0   :  { %174 = vst.msk [vmem:[%s368_s6 + $0xc] sm:$0xf] %vm154_vm1, %v166_v49  ;;  %v102_v50 = vpop.f32.mrf.mxu2 }
  0xa1   :  { %v103_v51 = vadd.f32 %v227_v6, %v102_v50  ;;  %v143_v52 = vpop.f32.mrf.mxu3 }
  0xa2   :  { %v144_v53 = vadd.f32 %v288_v7, %v143_v52 }
  0xa3   :  { %v153_v54 = vpack.c.bf16 %v103_v51, %v103_v51 }
  0xa4   :  { %v170_v55 = vpack.c.bf16 %v144_v53, %v144_v53 }
  0xa5   :  { %162 = vst.msk [vmem:[%s367_s5 + $0x1c] sm:$0xf] %vm154_vm1, %v153_v54 }
  0xa6   :  { %178 = vst.msk [vmem:[%s368_s6 + $0x1c] sm:$0xf] %vm154_vm1, %v170_v55 }

</bundles_post_ra>
